<compile_context>
chip_gen: v7x
topology: tpu7x:2x2x1
jax: 0.10.0
libtpu: 0.0.40
codegen_flags: <defaults>
</compile_context>

<pallas_src>
import functools

import jax
import jax.numpy as jnp
from jax.experimental import pallas as pl
from jax.experimental.pallas import tpu as pltpu

HIDDEN_FACTOR = 4
DROPOUT = 0.1  # unused at inference (identity)

_MIB = 1024 * 1024


def _round_up(x, m):
    return (x + m - 1) // m * m


@functools.lru_cache(maxsize=1)
def _vmem_capacity_bytes():
    """Physical VMEM per core; conservative 64 MiB (v7x) fallback."""
    try:
        info = pltpu.get_tpu_info()
        cap = int(getattr(info, "vmem_capacity_bytes", 0) or 0)
        if cap > 0:
            return cap
    except Exception:
        pass
    return 64 * _MIB


@functools.lru_cache(maxsize=1)
def _default_tiles():
    """(tm, tH, vmem_limit_cap) sized per TPU generation."""
    vmem = _vmem_capacity_bytes()
    if vmem >= 100 * _MIB:          # v5e / v6e: 128 MiB VMEM
        return 512, 1024, 110 * _MIB
    return 512, 512, 56 * _MIB       # v7x / unknown: 64 MiB VMEM


def _resolve_cfg(tm, th, compute_dtype, x_dtype):
    d_tm, d_th, cap = _default_tiles()
    tm = d_tm if tm is None else tm
    th = d_th if th is None else th
    th = max(128, _round_up(th, 128))
    if compute_dtype is None:
        # Default to bf16 MXU compute for f32 inputs; accumulation stays f32.
        compute_dtype = jnp.bfloat16 if x_dtype == jnp.float32 else x_dtype
    return tm, th, cap, jnp.dtype(compute_dtype)


def _ffn_kernel(x_ref, w1_ref, b1_ref, w2_ref, b2_ref, o_ref, acc_ref):
    # x_ref:  (tm, Dp)    w1_ref: (Dp, tH)   b1_ref: (1, tH)
    # w2_ref: (tH, Dp)    b2_ref: (1, Dp)    o_ref:  (tm, Dp)   acc_ref: (tm, Dp) f32
    h = pl.program_id(1)
    nh = pl.num_programs(1)

    x = x_ref[...]
    # First matmul partial over this hidden tile + bias + ReLU (exact per tile).
    hid = jnp.dot(x, w1_ref[...], preferred_element_type=jnp.float32) + b1_ref[...]
    hid = jnp.maximum(hid, 0.0).astype(x.dtype)
    # Second matmul partial (f32 accumulation).
    partial = jnp.dot(hid, w2_ref[...], preferred_element_type=jnp.float32)

    @pl.when(h == 0)
    def _():
        acc_ref[...] = partial            # first tile: plain store (no zero-init pass)

    @pl.when(h > 0)
    def _():
        acc_ref[...] += partial

    @pl.when(h == nh - 1)
    def _():
        # Dropout(eval) == identity.
        o_ref[...] = (acc_ref[...] + b2_ref[...]).astype(o_ref.dtype)


def prepare_params(w1, b1, w2, b2, *, tile_hidden=None, compute_dtype=jnp.bfloat16):
    """Pad/cast weights once OUTSIDE jit so feed_forward can skip per-call work.

    w1: [D, H], b1: [H], w2: [H, D], b2: [D] (weights transposed vs. nn.Linear).
    """
    D, H = w1.shape
    _, d_th, _ = _default_tiles()
    th = d_th if tile_hidden is None else tile_hidden
    th = max(128, _round_up(th, 128))
    D_p = _round_up(D, 128)
    tH = min(th, _round_up(H, 128))
    H_p = _round_up(H, tH)
    dt = jnp.dtype(compute_dtype)
    w1p = jnp.pad(jnp.asarray(w1, dt), ((0, D_p - D), (0, H_p - H)))
    b1p = jnp.pad(jnp.asarray(b1, jnp.float32), (0, H_p - H)).reshape(1, H_p)
    w2p = jnp.pad(jnp.asarray(w2, dt), ((0, H_p - H), (0, D_p - D)))
    b2p = jnp.pad(jnp.asarray(b2, jnp.float32), (0, D_p - D)).reshape(1, D_p)
    return w1p, b1p, w2p, b2p


@functools.partial(jax.jit, static_argnames=("tm", "th", "compute_dtype"))
def feed_forward(x, w1, b1, w2, b2, *, tm=None, th=None, compute_dtype=None):
    """x: [B, S, D] -> [B, S, D].

    w1: [D, H] (or pre-padded [D_p, H_p]), b1: [H], w2: [H, D], b2: [D].
    Weights are stored transposed vs. PyTorch nn.Linear so the hot path is two
    plain MXU matmuls.  Pass prepare_params() outputs to skip per-call pad/cast.
    """
    B, S, D = x.shape
    tm, th, vmem_cap, dt = _resolve_cfg(tm, th, compute_dtype, x.dtype)
    itemsize = dt.itemsize
    out_itemsize = jnp.dtype(x.dtype).itemsize

    M = B * S
    D_p = _round_up(D, 128)
    H = w1.shape[1]                         # may already be padded
    tH = min(th, _round_up(H, 128))
    H_p = _round_up(H, tH)                  # pad H up to a multiple of the tile (exact)

    # Row tile: large enough to amortize weight streaming; keep >=2 row tiles
    # when M allows (two-TC / megacore sharding of the "parallel" axis).
    tm_eff = max(16, min(_round_up(tm, 16), _round_up(M, 16)))
    if M >= 256 and _round_up(M, tm_eff) // tm_eff < 2:
        tm_eff = max(128, _round_up((M + 1) // 2, 16))
    M_p = _round_up(M, tm_eff)

    grid_m = M_p // tm_eff
    grid_h = H_p // tH

    # --- Inputs: cast/pad only when needed (static checks; no-ops when pre-padded). ---
    x2 = x.reshape(M, D)
    if x2.dtype != dt:
        x2 = x2.astype(dt)
    if (M_p, D_p) != (M, D):
        x2 = jnp.pad(x2, ((0, M_p - M), (0, D_p - D)))

    def _prep_w(w, shape):
        w = w if w.dtype == dt else w.astype(dt)
        if w.shape != shape:
            w = jnp.pad(w, tuple((0, s - d) for s, d in zip(shape, w.shape)))
        return w

    def _prep_b(b, n):
        b = jnp.asarray(b, jnp.float32).reshape(1, -1)
        if b.shape[1] != n:
            b = jnp.pad(b, ((0, 0), (0, n - b.shape[1])))
        return b

    w1p = _prep_w(w1, (D_p, H_p))
    w2p = _prep_w(w2, (H_p, D_p))
    b1p = _prep_b(b1, H_p)
    b2p = _prep_b(b2, D_p)

    # --- VMEM budget (double-buffered tiles + f32 accumulator + hid temp). ---
    est = (2 * tm_eff * D_p * itemsize          # x double buffer
           + 2 * tm_eff * D_p * out_itemsize    # out double buffer
           + 2 * D_p * tH * itemsize            # W1 tiles
           + 2 * tH * D_p * itemsize            # W2 tiles
           + 2 * (tH + D_p) * 4                 # biases
           + tm_eff * D_p * 4                   # f32 accumulator
           + tm_eff * tH * (4 + itemsize))      # f32 hid intermediate + cast copy
    vmem_limit = int(min(max(32 * _MIB, 2 * est), vmem_cap))

    cost = pl.CostEstimate(
        flops=4 * M_p * D_p * H_p,
        transcendentals=0,
        bytes_accessed=(M_p * D_p * (itemsize + out_itemsize)        # x in + out
                        + grid_m * 2 * D_p * H_p * itemsize          # streamed weights
                        + (H_p + D_p) * 4),                          # biases
    )

    out2 = pl.pallas_call(
        _ffn_kernel,
        out_shape=jax.ShapeDtypeStruct((M_p, D_p), x.dtype),
        grid_spec=pltpu.PrefetchScalarGridSpec(
            num_scalar_prefetch=0,
            grid=(grid_m, grid_h),
            in_specs=[
                pl.BlockSpec((tm_eff, D_p), lambda i, h: (i, 0)),  # x tile
                pl.BlockSpec((D_p, tH), lambda i, h: (0, h)),      # W1[:, h_tile]
                pl.BlockSpec((1, tH), lambda i, h: (0, h)),        # b1[h_tile]
                pl.BlockSpec((tH, D_p), lambda i, h: (h, 0)),      # W2[h_tile, :]
                pl.BlockSpec((1, D_p), lambda i, h: (0, 0)),       # b2
            ],
            out_specs=pl.BlockSpec((tm_eff, D_p), lambda i, h: (i, 0)),
            scratch_shapes=[pltpu.VMEM((tm_eff, D_p), jnp.float32)],
        ),
        compiler_params=pltpu.CompilerParams(
            dimension_semantics=("parallel", "arbitrary"),
            vmem_limit_bytes=vmem_limit,
        ),
        cost_estimate=cost,
    )(x2, w1p, b1p, w2p, b2p)

    return out2[:M, :D].reshape(B, S, D)


def init_params(key, model_dim):
    """Deterministic init mirroring nn.Linear shapes (weights stored transposed)."""
    hidden_dim = model_dim * HIDDEN_FACTOR
    k1, k2, k3, k4 = jax.random.split(key, 4)
    lim1 = 1.0 / (model_dim ** 0.5)
    lim2 = 1.0 / (hidden_dim ** 0.5)
    w1 = jax.random.uniform(k1, (model_dim, hidden_dim), jnp.float32, -lim1, lim1)
    b1 = jax.random.uniform(k2, (hidden_dim,), jnp.float32, -lim1, lim1)
    w2 = jax.random.uniform(k3, (hidden_dim, model_dim), jnp.float32, -lim2, lim2)
    b2 = jax.random.uniform(k4, (model_dim,), jnp.float32, -lim2, lim2)
    return w1, b1, w2, b2


def _ref(x, w1, b1, w2, b2):
    B, S, D = x.shape
    r = jnp.maximum(x.reshape(-1, D) @ w1 + b1, 0.0) @ w2 + b2
    return r.reshape(B, S, D)


if __name__ == "__main__":
    key = jax.random.PRNGKey(0)
    kx, kp, kx2, kp2 = jax.random.split(key, 4)

    # --- Small exact-path correctness check (force f32 compute). ---
    batch, seq, model_dim = 2, 8, 32
    x = jax.random.normal(kx, (batch, seq, model_dim), jnp.float32)
    w1, b1, w2, b2 = init_params(kp, model_dim)

    out = feed_forward(x, w1, b1, w2, b2, compute_dtype=jnp.float32)
    out = jax.block_until_ready(out)
    ref = _ref(x, w1, b1, w2, b2)
    assert out.shape == (batch, seq, model_dim)
    assert jnp.allclose(out, ref, atol=1e-5, rtol=1e-5)

    # --- Default path: bf16 MXU compute, f32 accumulation, pre-padded weights. ---
    batch2, seq2, model_dim2 = 2, 128, 256
    x_big = jax.random.normal(kx2, (batch2, seq2, model_dim2), jnp.float32)
    w1b, b1b, w2b, b2b = init_params(kp2, model_dim2)
    w1p, b1p, w2p, b2p = prepare_params(w1b, b1b, w2b, b2b)   # pad/cast once, outside jit

    out_bf16 = feed_forward(x_big, w1p, b1p, w2p, b2p)
    out_bf16 = jax.block_until_ready(out_bf16)
    ref_big = _ref(x_big, w1b, b1b, w2b, b2b)
    assert out_bf16.shape == (batch2, seq2, model_dim2)
    assert jnp.allclose(out_bf16.astype(jnp.float32), ref_big, atol=0.2, rtol=0.1)

    print("KERNEL_OK")
</pallas_src>

<mosaic_0001>
module attributes {stable_mosaic.version = 11 : i64} {
  func.func @_ffn_kernel(%arg0: i32, %arg1: i32, %arg2: memref<16x128xf32, #tpu.memory_space<vmem>>, %arg3: memref<128x128xf32, #tpu.memory_space<vmem>>, %arg4: memref<1x128xf32, #tpu.memory_space<vmem>>, %arg5: memref<128x128xf32, #tpu.memory_space<vmem>>, %arg6: memref<1x128xf32, #tpu.memory_space<vmem>>, %arg7: memref<16x128xf32, #tpu.memory_space<vmem>>, %arg8: memref<16x128xf32, #tpu.memory_space<vmem>>) attributes {dimension_semantics = [#tpu.dimension_semantics<parallel>, #tpu.dimension_semantics<arbitrary>], iteration_bounds = array<i64: 1, 1>, scalar_prefetch = 0 : i64, scratch_operands = 1 : i64, tpu.core_type = #tpu.core_type<tc>, window_params = [{transform_indices = @transform_0, window_bounds = array<i64: 16, 128>}, {transform_indices = @transform_1, window_bounds = array<i64: 128, 128>}, {transform_indices = @transform_2, window_bounds = array<i64: 1, 128>}, {transform_indices = @transform_3, window_bounds = array<i64: 128, 128>}, {pipeline_mode = #tpu.pipeline_mode<synchronous>, transform_indices = @transform_4, window_bounds = array<i64: 1, 128>}, {transform_indices = @transform_5, window_bounds = array<i64: 16, 128>}]} {
    %c0 = arith.constant 0 : index
    %c0_0 = arith.constant 0 : index
    %0 = vector.load %arg2[%c0, %c0_0] : memref<16x128xf32, #tpu.memory_space<vmem>>, vector<16x128xf32>
    %c0_1 = arith.constant 0 : index
    %c0_2 = arith.constant 0 : index
    %1 = vector.load %arg3[%c0_1, %c0_2] : memref<128x128xf32, #tpu.memory_space<vmem>>, vector<128x128xf32>
    %cst = arith.constant dense<0.000000e+00> : vector<16x128xf32>
    %2 = tpu.matmul %0, %1, %cst {dimension_numbers = #tpu.dot_dimension_numbers<[1], [0], [0], [1], [0, 0, 1, 1], [], []>} : vector<16x128xf32>, vector<128x128xf32>, vector<16x128xf32> -> vector<16x128xf32>
    %c0_3 = arith.constant 0 : index
    %c0_4 = arith.constant 0 : index
    %3 = vector.load %arg4[%c0_3, %c0_4] : memref<1x128xf32, #tpu.memory_space<vmem>>, vector<1x128xf32>
    %4 = vector.broadcast %3 : vector<1x128xf32> to vector<16x128xf32>
    %5 = arith.addf %2, %4 : vector<16x128xf32>
    %cst_5 = arith.constant 0.000000e+00 : f32
    %6 = vector.broadcast %cst_5 : f32 to vector<16x128xf32>
    %7 = arith.maximumf %5, %6 : vector<16x128xf32>
    %c0_6 = arith.constant 0 : index
    %c0_7 = arith.constant 0 : index
    %8 = vector.load %arg5[%c0_6, %c0_7] : memref<128x128xf32, #tpu.memory_space<vmem>>, vector<128x128xf32>
    %cst_8 = arith.constant dense<0.000000e+00> : vector<16x128xf32>
    %9 = tpu.matmul %7, %8, %cst_8 {dimension_numbers = #tpu.dot_dimension_numbers<[1], [0], [0], [1], [0, 0, 1, 1], [], []>} : vector<16x128xf32>, vector<128x128xf32>, vector<16x128xf32> -> vector<16x128xf32>
    %c0_i32 = arith.constant 0 : i32
    %10 = arith.cmpi eq, %arg1, %c0_i32 : i32
    %11 = arith.extui %10 : i1 to i32
    %c0_i32_9 = arith.constant 0 : i32
    %12 = arith.cmpi ne, %11, %c0_i32_9 : i32
    scf.if %12 {
      %c0_14 = arith.constant 0 : index
      %c0_15 = arith.constant 0 : index
      %19 = vector.load %arg8[%c0_14, %c0_15] : memref<16x128xf32, #tpu.memory_space<vmem>>, vector<16x128xf32>
      tpu.vector_store %arg8[%c0_14, %c0_15], %9 {strides = array<i32>} : memref<16x128xf32, #tpu.memory_space<vmem>>, vector<16x128xf32>,
    } else {
    }
    %c0_i32_10 = arith.constant 0 : i32
    %13 = arith.cmpi sgt, %arg1, %c0_i32_10 : i32
    %14 = arith.extui %13 : i1 to i32
    %c0_i32_11 = arith.constant 0 : i32
    %15 = arith.cmpi ne, %14, %c0_i32_11 : i32
    scf.if %15 {
      %c0_14 = arith.constant 0 : index
      %c0_15 = arith.constant 0 : index
      %19 = vector.load %arg8[%c0_14, %c0_15] : memref<16x128xf32, #tpu.memory_space<vmem>>, vector<16x128xf32>
      %20 = arith.addf %19, %9 : vector<16x128xf32>
      %c0_16 = arith.constant 0 : index
      %c0_17 = arith.constant 0 : index
      %21 = vector.load %arg8[%c0_16, %c0_17] : memref<16x128xf32, #tpu.memory_space<vmem>>, vector<16x128xf32>
      tpu.vector_store %arg8[%c0_16, %c0_17], %20 {strides = array<i32>} : memref<16x128xf32, #tpu.memory_space<vmem>>, vector<16x128xf32>,
    } else {
    }
    %c0_i32_12 = arith.constant 0 : i32
    %16 = arith.cmpi eq, %arg1, %c0_i32_12 : i32
    %17 = arith.extui %16 : i1 to i32
    %c0_i32_13 = arith.constant 0 : i32
    %18 = arith.cmpi ne, %17, %c0_i32_13 : i32
    scf.if %18 {
      %c0_14 = arith.constant 0 : index
      %c0_15 = arith.constant 0 : index
      %19 = vector.load %arg8[%c0_14, %c0_15] : memref<16x128xf32, #tpu.memory_space<vmem>>, vector<16x128xf32>
      %c0_16 = arith.constant 0 : index
      %c0_17 = arith.constant 0 : index
      %20 = vector.load %arg6[%c0_16, %c0_17] : memref<1x128xf32, #tpu.memory_space<vmem>>, vector<1x128xf32>
      %21 = vector.broadcast %20 : vector<1x128xf32> to vector<16x128xf32>
      %22 = arith.addf %19, %21 : vector<16x128xf32>
      %c0_18 = arith.constant 0 : index
      %c0_19 = arith.constant 0 : index
      %23 = vector.load %arg7[%c0_18, %c0_19] : memref<16x128xf32, #tpu.memory_space<vmem>>, vector<16x128xf32>
      tpu.vector_store %arg7[%c0_18, %c0_19], %22 {strides = array<i32>} : memref<16x128xf32, #tpu.memory_space<vmem>>, vector<16x128xf32>,
    } else {
    }
    return
  }
  func.func @transform_0(%arg0: i32, %arg1: i32) -> (i32, i32) {
    %c0_i32 = arith.constant 0 : i32
    %c0_i32_0 = arith.constant 0 : i32
    return %arg0, %c0_i32 : i32, i32
  }
  func.func @transform_1(%arg0: i32, %arg1: i32) -> (i32, i32) {
    %c0_i32 = arith.constant 0 : i32
    %c0_i32_0 = arith.constant 0 : i32
    return %c0_i32, %arg1 : i32, i32
  }
  func.func @transform_2(%arg0: i32, %arg1: i32) -> (i32, i32) {
    %c0_i32 = arith.constant 0 : i32
    %c0_i32_0 = arith.constant 0 : i32
    return %c0_i32, %arg1 : i32, i32
  }
  func.func @transform_3(%arg0: i32, %arg1: i32) -> (i32, i32) {
    %c0_i32 = arith.constant 0 : i32
    %c0_i32_0 = arith.constant 0 : i32
    return %arg1, %c0_i32 : i32, i32
  }
  func.func @transform_4(%arg0: i32, %arg1: i32) -> (i32, i32) {
    %c0_i32 = arith.constant 0 : i32
    %c0_i32_0 = arith.constant 0 : i32
    %c0_i32_1 = arith.constant 0 : i32
    return %c0_i32, %c0_i32_0 : i32, i32
  }
  func.func @transform_5(%arg0: i32, %arg1: i32) -> (i32, i32) {
    %c0_i32 = arith.constant 0 : i32
    %c0_i32_0 = arith.constant 0 : i32
    return %arg0, %c0_i32 : i32, i32
  }
}

</mosaic_0001>

<bundles_post_ra>
// kernel: feed_forward.1
= control target key start
LH: loop header
LB: loop body
LE: loop exit
PB: predicated region body
PF: predicated region fallthrough
CT: control target
= control target key end

     0   :  { %s565_s1 = inlined_call_operand.vmem [shape: f32[128,128], index: 1, kind: input, shape index: {}]   ;;  %s566_s0 = inlined_call_operand.vmem [shape: f32[16,128], index: 0, kind: input, shape index: {}]   ;;  %s567_s3 = inlined_call_operand.vmem [shape: f32[128,128], index: 3, kind: input, shape index: {}]   ;;  %s568_s2 = inlined_call_operand.vmem [shape: f32[1,128], index: 2, kind: input, shape index: {}]   ;;  %s569_s4 = inlined_call_operand.vmem [shape: f32[1,128], index: 4, kind: input, shape index: {}]   ;;  %s570_s5 = inlined_call_operand.vmem [shape: f32[16,128], index: 5, kind: output, shape index: {}]  }
   0x1   :  { %v22_v0 = vld [vmem:[%s565_s1] sm:$0xff]  ;;  %v23_v1 = vld [vmem:[%s565_s1 + $0x8] sm:$0xff]  ;;  %v24_v2 = vld [vmem:[%s565_s1 + $0x10] sm:$0xff] }
   0x2   :  { %v357_v3 = vpack.c.bf16 %v23_v1, %v22_v0  ;;  %v25_v4 = vld [vmem:[%s565_s1 + $0x18] sm:$0xff]  ;;  %v26_v6 = vld [vmem:[%s565_s1 + $0x20] sm:$0xff]  ;;  %v27_v7 = vld [vmem:[%s565_s1 + $0x28] sm:$0xff] }
   0x3   :  { %v361_v5 = vpack.c.bf16 %v25_v4, %v24_v2  ;;  %v365_v8 = vpack.c.bf16 %v27_v7, %v26_v6  ;;  %v28_v9 = vld [vmem:[%s565_s1 + $0x30] sm:$0xff]  ;;  %v29_v10 = vld [vmem:[%s565_s1 + $0x38] sm:$0xff]  ;;  %v20_v11 = vld [vmem:[%s566_s0] sm:$0xff] }
   0x4   :  { %358 = vmatprep.subr.bf16.mxu0 %v357_v3  ;;  %319 = vmatprep.mubr.f32.mxu0 %v20_v11  ;;  %v122_v12 = vld [vmem:[%s567_s3] sm:$0xff]  ;;  %v123_v13 = vld [vmem:[%s567_s3 + $0x8] sm:$0xff]  ;;  %v124_v14 = vld [vmem:[%s567_s3 + $0x10] sm:$0xff]  ;;  %v369_v20 = vpack.c.bf16 %v29_v10, %v28_v9 }
   0x5   :  { %360 = vmatpush3.bf16.msra.mxu0 %v357_v3  ;;  %v389_v15 = vpack.c.bf16 %v123_v13, %v122_v12  ;;  %v125_v16 = vld [vmem:[%s567_s3 + $0x18] sm:$0xff]  ;;  %v126_v18 = vld [vmem:[%s567_s3 + $0x20] sm:$0xff]  ;;  %v127_v19 = vld [vmem:[%s567_s3 + $0x28] sm:$0xff] }
   0x6   :  { %362 = vmatprep.subr.bf16.mxu0 %v361_v5  ;;  %v393_v17 = vpack.c.bf16 %v125_v16, %v124_v14  ;;  %v30_v21 = vld [vmem:[%s565_s1 + $0x40] sm:$0xff]  ;;  %v31_v22 = vld [vmem:[%s565_s1 + $0x48] sm:$0xff]  ;;  %v397_v23 = vpack.c.bf16 %v127_v19, %v126_v18  ;;  %v128_v24 = vld [vmem:[%s567_s3 + $0x30] sm:$0xff] }
   0x7   :  { %390 = vmatprep.subr.bf16.mxu1 %v389_v15  ;;  %v129_v25 = vld [vmem:[%s567_s3 + $0x38] sm:$0xff]  ;;  %v373_v26 = vpack.c.bf16 %v31_v22, %v30_v21  ;;  %v32_v27 = vld [vmem:[%s565_s1 + $0x50] sm:$0xff]  ;;  %v130_v30 = vld [vmem:[%s567_s3 + $0x40] sm:$0xff] }
   0x8   :  { %392 = vmatpush3.bf16.msra.mxu1 %v389_v15  ;;  %v33_v28 = vld [vmem:[%s565_s1 + $0x58] sm:$0xff]  ;;  %v401_v29 = vpack.c.bf16 %v129_v25, %v128_v24  ;;  %v131_v31 = vld [vmem:[%s567_s3 + $0x48] sm:$0xff]  ;;  %v34_v33 = vld [vmem:[%s565_s1 + $0x60] sm:$0xff] }
   0x9   :  { %364 = vmatpush3.bf16.msra.mxu0 %v361_v5  ;;  %394 = vmatprep.subr.bf16.mxu1 %v393_v17  ;;  %v377_v32 = vpack.c.bf16 %v33_v28, %v32_v27  ;;  %v35_v34 = vld [vmem:[%s565_s1 + $0x68] sm:$0xff]  ;;  %v405_v35 = vpack.c.bf16 %v131_v31, %v130_v30  ;;  %v132_v36 = vld [vmem:[%s567_s3 + $0x50] sm:$0xff]  ;;  %v133_v37 = vld [vmem:[%s567_s3 + $0x58] sm:$0xff] }
   0xa   :  { %366 = vmatprep.subr.bf16.mxu0 %v365_v8  ;;  %v381_v38 = vpack.c.bf16 %v35_v34, %v34_v33  ;;  %v36_v39 = vld [vmem:[%s565_s1 + $0x70] sm:$0xff]  ;;  %v37_v40 = vld [vmem:[%s565_s1 + $0x78] sm:$0xff]  ;;  %v409_v41 = vpack.c.bf16 %v133_v37, %v132_v36  ;;  %v134_v42 = vld [vmem:[%s567_s3 + $0x60] sm:$0xff] }
   0xb   :  { %v135_v43 = vld [vmem:[%s567_s3 + $0x68] sm:$0xff]  ;;  %v385_v44 = vpack.c.bf16 %v37_v40, %v36_v39  ;;  %v136_v47 = vld [vmem:[%s567_s3 + $0x70] sm:$0xff]  ;;  %v137_v48 = vld [vmem:[%s567_s3 + $0x78] sm:$0xff] }
   0xc   :  { %396 = vmatpush3.bf16.msra.mxu1 %v393_v17  ;;  %v413_v45 = vpack.c.bf16 %v135_v43, %v134_v42  ;;  %v21_v46 = vld [vmem:[%s566_s0 + $0x8] sm:$0xff]  ;;  %v417_v49 = vpack.c.bf16 %v137_v48, %v136_v47  ;;  %v249_v50 = vld [vmem:[%s568_s2] ss:$0 sm:$0xff] }
   0xd   :  { %368 = vmatpush3.bf16.msra.mxu0 %v365_v8  ;;  %398 = vmatprep.subr.bf16.mxu1 %v397_v23  ;;  %v250_v57 = vld [vmem:[%s569_s4] ss:$0 sm:$0xff] }
   0xe   :  { %370 = vmatprep.subr.bf16.mxu0 %v369_v20 }
  0x10   :  { %400 = vmatpush3.bf16.msra.mxu1 %v397_v23 }
  0x11   :  { %372 = vmatpush3.bf16.msra.mxu0 %v369_v20  ;;  %402 = vmatprep.subr.bf16.mxu1 %v401_v29 }
  0x12   :  { %374 = vmatprep.subr.bf16.mxu0 %v373_v26 }
  0x14   :  { %404 = vmatpush3.bf16.msra.mxu1 %v401_v29 }
  0x15   :  { %376 = vmatpush3.bf16.msra.mxu0 %v373_v26  ;;  %406 = vmatprep.subr.bf16.mxu1 %v405_v35 }
  0x16   :  { %378 = vmatprep.subr.bf16.mxu0 %v377_v32 }
  0x18   :  { %408 = vmatpush3.bf16.msra.mxu1 %v405_v35 }
  0x19   :  { %380 = vmatpush3.bf16.msra.mxu0 %v377_v32  ;;  %410 = vmatprep.subr.bf16.mxu1 %v409_v41 }
  0x1a   :  { %382 = vmatprep.subr.bf16.mxu0 %v381_v38 }
  0x1c   :  { %412 = vmatpush3.bf16.msra.mxu1 %v409_v41 }
  0x1d   :  { %384 = vmatpush3.bf16.msra.mxu0 %v381_v38  ;;  %414 = vmatprep.subr.bf16.mxu1 %v413_v45 }
  0x1e   :  { %386 = vmatprep.subr.bf16.mxu0 %v385_v44 }
  0x20   :  { %416 = vmatpush3.bf16.msra.mxu1 %v413_v45 }
  0x21   :  { %388 = vmatpush3.bf16.msra.mxu0 %v385_v44  ;;  %418 = vmatprep.subr.bf16.mxu1 %v417_v49 }
  0x24   :  { %320 = vmatmul.mubr.f32.vlgmr.msra.gmra.mrb[0].mxu0 %v21_v46  ;;  %420 = vmatpush3.bf16.msra.mxu1 %v417_v49 }
  0xf7   :  { %v321_v51 = vpop.f32.mrb[0].mxu0 }
  0xf8   :  { %v117_v52 = vadd.f32 %v321_v51, %v249_v50  ;;  %v111_v53 = vpop.f32.mrb[1].mxu0 }
  0xf9   :  { %v112_v54 = vadd.f32 %v249_v50, %v111_v53 }
  0xfa   :  { %v121_v56 = vmax.f32 %v117_v52, 0.0 }
  0xfb   :  { %v120_v55 = vmax.f32 %v112_v54, 0.0 }
  0xfd   :  { %354 = vmatprep.mubr.f32.mxu1 %v120_v55 }
  0xfe   :  { %355 = vmatmul.mubr.f32.vlgmr.msra.gmra.mrb[0].mxu1 %v121_v56 }
 0x1d1   :  { %v356_v58 = vpop.f32.mrb[0].mxu1 }
 0x1d2   :  { %v242_v59 = vadd.f32 %v356_v58, %v250_v57  ;;  %v204_v60 = vpop.f32.mrb[1].mxu1 }
 0x1d3   :  { %v241_v61 = vadd.f32 %v250_v57, %v204_v60 }
 0x1d4   :  { %244 = vst [vmem:[%s570_s5 + $0x8] sm:$0xff] %v242_v59 }
 0x1d5   :  { %243 = vst [vmem:[%s570_s5] sm:$0xff] %v241_v61 }

</bundles_post_ra>
